<compile_context>
chip_gen: v7x
topology: tpu7x:2x2x1
jax: 0.10.0
libtpu: 0.0.40
codegen_flags: <defaults>
</compile_context>

<pallas_src>
import functools

import jax
import jax.numpy as jnp
from jax import lax
from jax.experimental import pallas as pl
from jax.experimental.pallas import tpu as pltpu


def _round_up(x, m):
    return (x + m - 1) // m * m


def _vmem_spec():
    return pl.BlockSpec(memory_space=pltpu.MemorySpace.VMEM)


def _vmem_capacity_bytes():
    try:
        return int(pltpu.get_tpu_info().vmem_capacity_bytes)
    except Exception:
        return 64 << 20          # conservative fallback: v7x per-TC VMEM


# -----------------------------------------------------------------------------
# Kernel 1 (gridless, tiny): gram = concept^T @ concept via A @ B^T dot_general
# (no in-kernel transpose).  Kept f32 (feeds a matrix inverse / solve).
# -----------------------------------------------------------------------------
def gram_kernel(ct_ref, gram_ref):
    ct = ct_ref[...]                                                 # (C, D)
    gram_ref[...] = lax.dot_general(ct, ct, (((1,), (1,)), ((), ())),
                                    preferred_element_type=jnp.float32)


# -----------------------------------------------------------------------------
# Kernel 2: kNN sparsity statistics with in-kernel top-k.
# grid = (splits, tiles_per_split); axis 0 "parallel" (v7x megacore), axis 1
# "arbitrary" (running top-k reduction over M tiles, carried in VMEM scratch).
# Outputs are only the per-split top-k candidates: (splits, C, CARRY_W) each
# for the ranking score and the dot value — O(C*topk), not O(C*M).
# -----------------------------------------------------------------------------
def knn_topk_kernel(ct_ref, e_ref, score_out_ref, dot_out_ref,
                    sbuf_ref, dbuf_ref, *,
                    m_total, tm, tiles_per_split, topk, carry_w, mxu_dtype):
    i = pl.program_id(1)

    @pl.when(i == 0)
    def _init():
        sbuf_ref[...] = jnp.full_like(sbuf_ref, -jnp.inf)
        dbuf_ref[...] = jnp.zeros_like(dbuf_ref)

    ct = ct_ref[...]                                                 # (C, D) f32
    e = e_ref[...]                                                   # (tm, D) f32

    # dots[c, m] = <concept_c, e_m>; A @ B^T form feeds the MXU directly.
    dots = lax.dot_general(ct.astype(mxu_dtype), e.astype(mxu_dtype),
                           (((1,), (1,)), ((), ())),
                           preferred_element_type=jnp.float32)       # (C, tm)

    # ||e_m||^2 laid out along lanes: ones(8, D) @ (e*e)^T, keep row 0.
    ee = e * e
    ones = jnp.ones((8, ee.shape[1]), jnp.float32)
    e_sq = lax.dot_general(ones, ee, (((1,), (1,)), ((), ())),
                           preferred_element_type=jnp.float32)[0:1, :]   # (1, tm)

    # Larger score == smaller distance (per-row ||c||^2 dropped: order-preserving).
    score = 2.0 * dots - e_sq                                        # (C, tm)

    # Mask columns that are past M (tail tile / phantom tile) to -inf.
    tile_idx = pl.program_id(0) * tiles_per_split + i
    col = tile_idx * tm + lax.broadcasted_iota(jnp.int32, score.shape, 1)
    neg_inf = jnp.float32(-jnp.inf)
    score = jnp.where(col < m_total, score, neg_inf)

    # Stage the tile after the carry (first carry_w lanes) in the scratch buffer.
    sbuf_ref[:, carry_w:carry_w + tm] = score
    dbuf_ref[:, carry_w:carry_w + tm] = dots
    comb_score = sbuf_ref[...]                                       # (C, carry_w+tm)
    comb_dot = dbuf_ref[...]

    c_rows, width = comb_score.shape
    lane = lax.broadcasted_iota(jnp.int32, (c_rows, width), 1)
    carry_lane = lax.broadcasted_iota(jnp.int32, (c_rows, carry_w), 1)
    new_score = jnp.full((c_rows, carry_w), neg_inf, jnp.float32)
    new_dot = jnp.zeros((c_rows, carry_w), jnp.float32)
    for j in range(topk):                        # topk is small; static unroll
        best = jnp.max(comb_score, axis=1, keepdims=True)            # (C, 1)
        sel_col = jnp.min(jnp.where(comb_score == best, lane, width),
                          axis=1, keepdims=True)                     # first argmax
        sel = lane == sel_col                                        # one-hot row mask
        best_dot = jnp.sum(jnp.where(sel, comb_dot, 0.0),
                           axis=1, keepdims=True)                    # (C, 1)
        new_score = jnp.where(carry_lane == j, best, new_score)
        new_dot = jnp.where(carry_lane == j, best_dot, new_dot)
        comb_score = jnp.where(sel, neg_inf, comb_score)

    sbuf_ref[:, :carry_w] = new_score            # updated running top-k carry
    dbuf_ref[:, :carry_w] = new_dot

    @pl.when(i == tiles_per_split - 1)
    def _emit():
        score_out_ref[...] = new_score[None, :, :]
        dot_out_ref[...] = new_dot[None, :, :]


# -----------------------------------------------------------------------------
# Kernel 3 (grid over N, "parallel"): fused prediction head.
#   [y_pred | orig_pred] = x @ [R | W^T] + [b | b]   -- single MXU pass.
# Only used above a row threshold; below it a plain f32 jnp.dot is cheaper.
# -----------------------------------------------------------------------------
def pred_kernel(x_ref, w2_ref, b2_ref, y2_ref, *, mxu_dtype):
    x = x_ref[...].astype(mxu_dtype)
    w2 = w2_ref[...].astype(mxu_dtype)
    y2_ref[...] = jnp.dot(x, w2, preferred_element_type=jnp.float32) + b2_ref[...]


# -----------------------------------------------------------------------------
# Tiling helpers (full double-buffered footprint accounted).
# -----------------------------------------------------------------------------
def _knn_partition(m, d, c, budget_bytes, max_tile):
    """Return (tm, tiles_per_split, splits) for the kNN kernel."""
    # Rough VMEM bytes per M column: e block f32 x2 buffers + ee f32 + bf16 cast
    # + dots/score temps + staging buffers (C rows each).
    per_col = 14 * d + 40 * max(c, 8) + 64
    tm_cap = max(128, min(max_tile, (budget_bytes // per_col) // 128 * 128))
    if m < 256:
        return m, 1, 1                       # single full-extent tile, no split
    # Guarantee >= 2 tiles so the "parallel" axis has >= 2 steps (v7x: 2 TCs).
    tm = min(tm_cap, _round_up(pl.cdiv(m, 2), 128))
    total_tiles = pl.cdiv(m, tm)
    splits = 2 if total_tiles >= 2 else 1
    return tm, pl.cdiv(total_tiles, splits), splits


def _pred_tile(n, d, k2, budget_bytes):
    if n < 256:
        return n
    per_row = 10 * d + 12 * k2 + 64
    tn = max(128, min(2048, (budget_bytes // per_row) // 128 * 128))
    return min(tn, _round_up(pl.cdiv(n, 2), 128))   # >= 2 parallel steps


# -----------------------------------------------------------------------------
# Forward
# -----------------------------------------------------------------------------
def concept_net_forward(train_embedding, concept, train_embeddings, w, b, topk,
                        *, mxu_dtype=jnp.bfloat16, pred_pallas_min_rows=1024,
                        knn_max_tile=None):
    """Mirrors ConceptNet.forward(train_embedding, h_x, topk).

    train_embedding  : (N, D) batch fed to forward
    concept          : (D, C) parameter
    train_embeddings : (M, D) stored training set (module stores its transpose)
    w, b             : linear head, w (num_classes, D), b (num_classes,)
    Returns (orig_pred, y_pred, L_sparse_1, L_sparse_2,
             (norm_metrics, similarity_penalty)).
    h_x is unused by the PyTorch forward, so it is not an argument here.
    """
    x = train_embedding.astype(jnp.float32)
    concept = concept.astype(jnp.float32)
    emb = train_embeddings.astype(jnp.float32)
    n, d = x.shape
    c = concept.shape[1]
    m = emb.shape[0]
    k = w.shape[0]
    topk = int(topk)
    assert 1 <= topk <= m, "topk must be in [1, number of stored embeddings]"

    vmem_cap = _vmem_capacity_bytes()
    budget = vmem_cap // 3
    vmem_limit = min(3 * vmem_cap // 4, 64 << 20)
    if knn_max_tile is None:
        knn_max_tile = 8192 if vmem_cap >= (96 << 20) else 4096

    concept_t = concept.T                     # (C, D): layout plumbing for A @ B^T

    # --- (C, C) gram ------------------------------------------------------------
    gram = pl.pallas_call(
        gram_kernel,
        out_shape=jax.ShapeDtypeStruct((c, c), jnp.float32),
        in_specs=[_vmem_spec()],
        out_specs=_vmem_spec(),
    )(concept_t)

    # --- scalar penalties from gram (tiny; free in XLA) -------------------------
    eye = jnp.eye(c, dtype=jnp.float32)
    L_sparse_2 = jnp.mean(gram * (1.0 - eye))
    norm_metrics = jnp.mean(gram * eye)
    similarity_penalty = jnp.mean(jnp.abs(gram - eye))

    # --- kNN sparsity loss: top-k selection fully inside the kernel -------------
    carry_w = max(128, _round_up(topk, 128))
    tm, tiles_per_split, splits = _knn_partition(m, d, c, budget, knn_max_tile)
    total_tiles = pl.cdiv(m, tm)
    last_tile = total_tiles - 1

    knn = functools.partial(
        knn_topk_kernel, m_total=m, tm=tm, tiles_per_split=tiles_per_split,
        topk=topk, carry_w=carry_w, mxu_dtype=mxu_dtype)
    top_scores, top_dots = pl.pallas_call(
        knn,
        out_shape=(jax.ShapeDtypeStruct((splits, c, carry_w), jnp.float32),
                   jax.ShapeDtypeStruct((splits, c, carry_w), jnp.float32)),
        grid=(splits, tiles_per_split),
        in_specs=[
            pl.BlockSpec((c, d), lambda h, i: (0, 0)),
            pl.BlockSpec(
                (tm, d),
                lambda h, i: (jnp.minimum(h * tiles_per_split + i, last_tile), 0)),
        ],
        out_specs=(pl.BlockSpec((1, c, carry_w), lambda h, i: (h, 0, 0)),
                   pl.BlockSpec((1, c, carry_w), lambda h, i: (h, 0, 0))),
        scratch_shapes=[pltpu.VMEM((c, carry_w + tm), jnp.float32),
                        pltpu.VMEM((c, carry_w + tm), jnp.float32)],
        compiler_params=pltpu.CompilerParams(
            dimension_semantics=("parallel", "arbitrary"),
            vmem_limit_bytes=vmem_limit),
    )(concept_t, emb)

    # TODO(synk): the final k-way merge of per-split candidates has no clean
    # Mosaic lowering; it is O(C * splits * topk) and stays in JAX.
    scores_f = jnp.moveaxis(top_scores, 0, 1).reshape(c, splits * carry_w)
    dots_f = jnp.moveaxis(top_dots, 0, 1).reshape(c, splits * carry_w)
    _, idx = lax.top_k(scores_f, topk)
    dots_sel = jnp.take_along_axis(dots_f, idx, axis=1)              # (C, topk)
    L_sparse_1 = jnp.mean(jnp.sum(dots_sel, axis=1) / topk)

    # --- prediction head collapsed by associativity ------------------------------
    # y_pred = x @ (concept @ gram^-1 @ concept^T @ W^T) + b = x @ R + b
    # TODO(synk): the tiny (C, C) solve (== torch.inverse on gram) stays in JAX.
    w_t = w.astype(jnp.float32).T                                    # (D, K)
    r = concept @ jnp.linalg.solve(gram, concept_t @ w_t)            # (D, K)
    w2 = jnp.concatenate([r, w_t], axis=1)                           # (D, 2K)
    b2 = jnp.concatenate([b, b]).astype(jnp.float32).reshape(1, 2 * k)

    if n < pred_pallas_min_rows:
        # 2K lanes << 128 and tiny N: launch / per-step overhead exceeds the matmul.
        y2 = x @ w2 + b2
    else:
        tn = _pred_tile(n, d, 2 * k, budget)
        y2 = pl.pallas_call(
            functools.partial(pred_kernel, mxu_dtype=mxu_dtype),
            out_shape=jax.ShapeDtypeStruct((n, 2 * k), jnp.float32),
            grid=(pl.cdiv(n, tn),),
            in_specs=[pl.BlockSpec((tn, d), lambda i: (i, 0)),
                      pl.BlockSpec((d, 2 * k), lambda i: (0, 0)),
                      pl.BlockSpec((1, 2 * k), lambda i: (0, 0))],
            out_specs=pl.BlockSpec((tn, 2 * k), lambda i: (i, 0)),
            compiler_params=pltpu.CompilerParams(
                dimension_semantics=("parallel",),
                vmem_limit_bytes=vmem_limit),
        )(x, w2, b2)
    y_pred, orig_pred = y2[:, :k], y2[:, k:]

    return orig_pred, y_pred, L_sparse_1, L_sparse_2, (norm_metrics, similarity_penalty)


# -----------------------------------------------------------------------------
# Pure-JAX reference (mirrors the PyTorch math) and checks.
# -----------------------------------------------------------------------------
def _reference_forward(x, concept, emb, w, b, topk):
    gram = concept.T @ concept
    c = concept.shape[1]
    eye = jnp.eye(c, dtype=jnp.float32)
    proj = concept @ jnp.linalg.inv(gram) @ concept.T
    y_ref = (proj @ x.T).T @ w.T + b
    o_ref = x @ w.T + b
    d_r = jnp.linalg.norm(emb[None, :, :] - concept.T[:, None, :], axis=-1)   # (C, M)
    idx_r = lax.top_k(-d_r, topk)[1]
    dots_r = (emb @ concept).T                                                # (C, M)
    l1_r = jnp.mean(jnp.sum(jnp.take_along_axis(dots_r, idx_r, axis=1), axis=1) / topk)
    l2_r = jnp.mean(gram * (1.0 - eye))
    nm_r = jnp.mean(gram * eye)
    sp_r = jnp.mean(jnp.abs(gram - eye))
    return o_ref, y_ref, l1_r, l2_r, (nm_r, sp_r)


def _check(out, ref, *, pred_atol, pred_rtol):
    o, y, l1, l2, (nm, sp) = out
    o_r, y_r, l1_r, l2_r, (nm_r, sp_r) = ref
    assert jnp.allclose(y, y_r, atol=pred_atol, rtol=pred_rtol), "y_pred mismatch"
    assert jnp.allclose(o, o_r, atol=pred_atol, rtol=pred_rtol), "orig_pred mismatch"
    # bf16 MXU inputs can reorder near-tie kNN neighbours -> looser tolerance for
    # this loss scalar (explicitly sanctioned by the perf review).
    assert jnp.allclose(l1, l1_r, atol=1.5e-1, rtol=5e-2), "L_sparse_1 mismatch"
    assert jnp.allclose(l2, l2_r, atol=1e-3, rtol=1e-3), "L_sparse_2 mismatch"
    assert jnp.allclose(nm, nm_r, atol=1e-3, rtol=1e-3), "norm_metrics mismatch"
    assert jnp.allclose(sp, sp_r, atol=1e-3, rtol=1e-3), "similarity_penalty mismatch"


if __name__ == "__main__":
    N, D, C, NUM_CLASSES, TOPK = 8, 32, 8, 4, 5

    key = jax.random.PRNGKey(0)
    k1, k2, k3, k4, k5, k6 = jax.random.split(key, 6)
    concept = jax.random.normal(k2, (D, C), dtype=jnp.float32)            # nn.Parameter
    w = 0.1 * jax.random.normal(k3, (NUM_CLASSES, D), dtype=jnp.float32)  # linear weight
    b = 0.1 * jax.random.normal(k4, (NUM_CLASSES,), dtype=jnp.float32)    # linear bias
    x = jax.random.normal(k5, (N, D), dtype=jnp.float32)                  # forward input

    # Config A: small stored set -> single-tile kNN kernel, plain-JAX pred head.
    emb_a = jax.random.normal(k1, (64, D), dtype=jnp.float32)
    out_a = jax.block_until_ready(concept_net_forward(x, concept, emb_a, w, b, TOPK))
    _check(out_a, _reference_forward(x, concept, emb_a, w, b, TOPK),
           pred_atol=1e-3, pred_rtol=1e-3)

    # Config B: larger stored set with a small forced tile -> exercises the
    # multi-tile carry merge, the 2-way parallel split, tail/phantom-tile
    # masking, and the Pallas prediction head (bf16 MXU).
    emb_b = jax.random.normal(k6, (320, D), dtype=jnp.float32)
    out_b = jax.block_until_ready(
        concept_net_forward(x, concept, emb_b, w, b, TOPK,
                            knn_max_tile=128, pred_pallas_min_rows=0))
    _check(out_b, _reference_forward(x, concept, emb_b, w, b, TOPK),
           pred_atol=5e-2, pred_rtol=5e-2)

    print("KERNEL_OK")
</pallas_src>

<mosaic_0001>
module attributes {stable_mosaic.version = 11 : i64} {
  func.func @gram_kernel(%arg0: memref<8x32xf32, #tpu.memory_space<vmem>>, %arg1: memref<8x8xf32, #tpu.memory_space<vmem>>) attributes {dimension_semantics = [], scalar_prefetch = 0 : i64, scratch_operands = 0 : i64, tpu.core_type = #tpu.core_type<tc>} {
    %c0 = arith.constant 0 : index
    %c0_0 = arith.constant 0 : index
    %0 = vector.load %arg0[%c0, %c0_0] : memref<8x32xf32, #tpu.memory_space<vmem>>, vector<8x32xf32>
    %cst = arith.constant dense<0.000000e+00> : vector<8x8xf32>
    %1 = tpu.matmul %0, %0, %cst {dimension_numbers = #tpu.dot_dimension_numbers<[1], [1], [0], [0], [0, 0, 1, 0], [], []>} : vector<8x32xf32>, vector<8x32xf32>, vector<8x8xf32> -> vector<8x8xf32>
    %c0_1 = arith.constant 0 : index
    %c0_2 = arith.constant 0 : index
    %2 = vector.load %arg1[%c0_1, %c0_2] : memref<8x8xf32, #tpu.memory_space<vmem>>, vector<8x8xf32>
    tpu.vector_store %arg1[%c0_1, %c0_2], %1 {strides = array<i32>} : memref<8x8xf32, #tpu.memory_space<vmem>>, vector<8x8xf32>,
    return
  }
}

</mosaic_0001>

<bundles_post_ra>
// kernel: tpu_custom_call.1
= control target key start
LH: loop header
LB: loop body
LE: loop exit
PB: predicated region body
PF: predicated region fallthrough
CT: control target
= control target key end

     0   :  { %6 = vsyncpa [#allocation3], 0  ;;  %s212_s0 = inlined_call_operand.hbm [shape: f32[8,32], index: 0, kind: input, shape index: {}]   ;;  %s213_s1 = inlined_call_operand.hbm [shape: f32[8,8], index: 1, kind: output, shape index: {}]  }
   0x1   :  { %7 = vsyncpa [#allocation4], 0  ;;  %s174_s6 = smov [#allocation2]   ;;  %s126_s10 = scalar_lea.hbm %s212_s0, 128 }
   0x2   :  { %s14_s7 = sshll.u32 %s174_s6, 4  ;;  %p127_p0 = scmp.ne.s32.totalorder %s212_s0, %s126_s10  ;;  %s15_s7 = int_to_ptr.vmem [resolvable:$true] %s14_s7 }
   0x3   :  { %p130_p1 = scmp.lt.u32.totalorder %s126_s10, %s212_s0 }
   0x5   :  { %p132_p2 = pnand %p130_p1, %p127_p0 }
   0x7   :  { %135 = shalt.err (!%p132_p2)
}
   0x8   :  { %s136_s15 = scalar_lea.vmem %s15_s7, 128  ;;  %p141_p4 = scmp.lt.s32.totalorder %s15_s7, %s15_s7 }
   0x9   :  { %p137_p3 = scmp.ne.s32.totalorder %s15_s7, %s136_s15  ;;  %p142_p5 = scmp.lt.s32.totalorder %s136_s15, %s136_s15 }
   0xb   :  { %p143_p6 = por %p142_p5, %p141_p4 }
   0xd   :  { %p144_p7 = pnand %p143_p6, %p137_p3 }
   0xf   :  { %147 = shalt.err (!%p144_p7)
}
  0x10   :  { %17 = dma.hbm_to_vmem [thread:$0]  %s212_s0, 128, %s15_s7, [#allocation3]  }
  0x11   :  { %170 = dma.done.wait [#allocation3], 128  }
  0x12   :  { %171 = vsyncadd [#allocation3], 4294967168  ;;  %v175_v0 = vmov 0.0   ;;  %vm176_vm0 = vmmov 0   ;;  %vm22_vm1 = vcmask 261120   ;;  %v21_v1 = vld [vmem:[#allocation2] sm:$0xff] }
  0x13   :  { %117 = vmatprep.subr.mxu0 %v175_v0  ;;  %119 = vmatprep.mubr.msk.f32.mxu0 %vm176_vm0, %v175_v0  ;;  %s177_s18 = smov [#allocation5]   ;;  %vm96_vm2 = vcmask 64512  }
  0x14   :  { %118 = vmatpush3.xpose.msk.msra.mxu0 %vm22_vm1, %v21_v1  ;;  %s104_s19 = sshll.u32 %s177_s18, 4  ;;  %s105_s19 = int_to_ptr.vmem [resolvable:$true] %s104_s19 }
  0x15   :  { %s148_s20 = scalar_lea.vmem %s105_s19, 128  ;;  %p153_p9 = scmp.lt.s32.totalorder %s105_s19, %s105_s19 }
  0x16   :  { %p149_p8 = scmp.ne.s32.totalorder %s105_s19, %s148_s20  ;;  %p154_p10 = scmp.lt.s32.totalorder %s148_s20, %s148_s20 }
  0x17   :  { %120 = vmatmul.mubr.msk.f32.vlgmr.msra.gmra.mrb[0].mxu0 %vm22_vm1, %v21_v1 }
  0x18   :  { %p155_p11 = por %p154_p10, %p153_p9 }
  0x1a   :  { %p156_p12 = pnand %p155_p11, %p149_p8 }
  0xea   :  { %v92_v2 = vpop.f32.mrb[0].mxu0 }
  0xeb   :  { %v121_v3 = vpop.f32.mrb[1].mxu0  ;;  %97 = vst.msk [vmem:[#allocation5] sm:$0xff] %vm96_vm2, %v92_v2 }
  0xec   :  { %159 = shalt.err (!%p156_p12)
}
  0xed   :  { %s160_s22 = scalar_lea.hbm %s213_s1, 128 }
  0xee   :  { %p161_p13 = scmp.ne.s32.totalorder %s213_s1, %s160_s22  ;;  %p164_p0 = scmp.lt.u32.totalorder %s160_s22, %s213_s1 }
  0xf0   :  { %p166_p1 = pnand %p164_p0, %p161_p13 }
  0xf2   :  { %169 = shalt.err (!%p166_p1)
}
  0xf3   :  { %107 = dma.vmem_to_hbm [thread:$0]  %s105_s19, 128, %s213_s1, [#allocation4]  }
  0xf4   :  { %172 = dma.done.wait [#allocation4], 128  }
  0xf5   :  { %173 = vsyncadd [#allocation4], 4294967168 }
  0xf6   :  { %111 = vsyncpa [#allocation3], 1 }
  0xf7   :  { %112 = vsyncpa [#allocation4], 1 }

</bundles_post_ra>
